<compile_context>
chip_gen: v5e
topology: v5e:2x2
jax: 0.10.0
libtpu: 0.0.40
codegen_flags: <defaults>
</compile_context>

<pallas_src>
import jax
import jax.numpy as jnp
from jax import lax
from jax.experimental import pallas as pl
from jax.experimental.pallas import tpu as pltpu


_MXU_MIN_CHANNELS = 64               # below this the VPU broadcast path wins
_ACC_VREG_BUDGET_BYTES = 192 * 1024  # keep the two accumulators ~vreg-resident


def _round_up(n, m):
    return ((n + m - 1) // m) * m


def _divisors(n):
    return [d for d in range(1, n + 1) if n % d == 0]


def _vmem_capacity_bytes():
    """Physical VMEM of the current generation (conservative fallback)."""
    try:
        cap = getattr(pltpu.get_tpu_info(), "vmem_capacity_bytes", None)
        if cap:
            return int(cap)
    except Exception:
        pass
    return 64 * 2 ** 20  # v7x per-TensorCore VMEM (smallest of v5e/v6e/v7x)


# ----------------------------------------------------------------------------
# VPU path (narrow channels): broadcast-multiply with vreg accumulators.
# ----------------------------------------------------------------------------

def _choose_vpu_tiles(cin, cout, b, lp, w_itemsize, vmem_budget):
    """Pick (cin_t, ct, l_t) from vreg + VMEM byte budgets."""
    l_cands = [128 * d for d in _divisors(lp // 128)]                 # lane-aligned
    ct_cands = sorted({t for t in _divisors(cout) if t % 8 == 0} | {cout})

    def acc_bytes(ct, lt):
        return 2 * b * ct * lt * 4                                    # f32 accumulators

    def parallel_steps(ct, lt):
        return (cout // ct) * (lp // lt)

    pairs = [(ct, lt) for ct in ct_cands for lt in l_cands]
    fitting = [p for p in pairs if acc_bytes(*p) <= _ACC_VREG_BUDGET_BYTES]
    if fitting:
        # Prefer >=2 parallel grid steps (feeds both v7x TensorCores), then the
        # largest tile (fewest grid steps, biggest DMA blocks).
        multi = [p for p in fitting if parallel_steps(*p) >= 2]
        pool = multi if multi else fitting
        ct, lt = max(pool, key=lambda p: (p[0] * p[1], p[0]))
    else:
        ct, lt = min(pairs, key=lambda p: p[0] * p[1])

    def block_bytes(cin_t):
        xb = cin_t * 2 * b * lt * 4
        wb = cin_t * 3 * ct * lt * w_itemsize
        ob = 2 * b * ct * lt * 4
        return 2 * (xb + wb + ob)                                     # double-buffered

    cin_t = 1
    for d in _divisors(cin):
        if block_bytes(d) <= vmem_budget:
            cin_t = d
    return cin_t, ct, lt


def _spectral_mix_vpu_kernel(x_ref, w_ref, o_ref):
    # x_ref: (cin_t, 2, B, l_t)   leading axis 1 = [real | imag]
    # w_ref: (cin_t, 3, ct, l_t)  leading axis 1 = [wr | wi-wr | wi+wr] (Gauss)
    # o_ref: (2, B, ct, l_t)      resident across the Cin ("arbitrary") grid axis
    # Note: hot (B, ct, l_t) temporaries put ct (>=8 at production sizes) on the
    # sublane axis, so small-B sublane padding only affects the small x tile.
    cin_t, _, b, l_t = x_ref.shape
    ct = w_ref.shape[2]

    def body(i, carry):
        acc_r, acc_i = carry
        xrow = x_ref[i]                       # (2, B, l_t) aligned full-width load
        wrow = w_ref[i].astype(jnp.float32)   # (3, ct, l_t) (bf16 -> f32 if needed)
        xr, xi = xrow[0], xrow[1]
        wr, wd, ws = wrow[0], wrow[1], wrow[2]
        # Gauss 3-multiply complex product, accumulated over Cin:
        #   out_r += xr*wr - xi*wi = k1 - xi*(wi+wr)
        #   out_i += xr*wi + xi*wr = k1 + xr*(wi-wr)
        k1 = (xr + xi)[:, None, :] * wr[None, :, :]          # (B, ct, l_t)
        acc_r = acc_r + (k1 - xi[:, None, :] * ws[None, :, :])
        acc_i = acc_i + (k1 + xr[:, None, :] * wd[None, :, :])
        return acc_r, acc_i

    # Right-size the unroll so unrolled (B, ct, l_t) temporaries + the two
    # accumulators stay well under the 64-vreg file.
    tile_vregs = max(1, (b * ct * l_t * 4) // 4096)
    unroll = max(1, min(cin_t, 4 if tile_vregs <= 4 else 2))

    zero = jnp.zeros((b, ct, l_t), jnp.float32)
    acc_r, acc_i = lax.fori_loop(0, cin_t, body, (zero, zero), unroll=unroll)

    ci = pl.program_id(2)

    @pl.when(ci == 0)
    def _init():
        # Direct, lane-dense full-width stores of both halves (no concatenate).
        o_ref[0] = acc_r
        o_ref[1] = acc_i

    @pl.when(ci > 0)
    def _accumulate():
        o_ref[0] = o_ref[0] + acc_r
        o_ref[1] = o_ref[1] + acc_i


def _spectral_mix_vpu(xr, xi, wr, wi, weight_dtype):
    """einsum('bil,iol->bol') in split real/imag form on the VPU.

    xr, xi: (B, Cin, L) f32;  wr, wi: (Cin, Cout, L) f32.
    Returns (out_r, out_i), each (B, Cout, L) f32.
    """
    b, cin, L = xr.shape
    cout = wr.shape[1]
    lp = _round_up(L, 128)              # lane-align the mode axis
    pad = lp - L

    x_packed = jnp.stack([jnp.transpose(xr, (1, 0, 2)),
                          jnp.transpose(xi, (1, 0, 2))], axis=1)      # (Cin,2,B,L)
    x_packed = jnp.pad(x_packed, ((0, 0), (0, 0), (0, 0), (0, pad)))

    # Gauss 3-multiply precombination on a leading axis: [wr | wi-wr | wi+wr].
    w_packed = jnp.stack([wr, wi - wr, wi + wr], axis=1)               # (Cin,3,Cout,L)
    w_packed = jnp.pad(w_packed, ((0, 0), (0, 0), (0, 0), (0, pad)))
    w_packed = w_packed.astype(weight_dtype)

    cap = _vmem_capacity_bytes()
    vmem_budget = max(16 * 2 ** 20, int(0.4 * cap))   # blocks ~<= 40% of physical VMEM
    cin_t, ct, l_t = _choose_vpu_tiles(
        cin, cout, b, lp, jnp.dtype(weight_dtype).itemsize, vmem_budget)
    grid = (cout // ct, lp // l_t, cin // cin_t)      # toy config collapses to (1,1,1)

    out = pl.pallas_call(
        _spectral_mix_vpu_kernel,
        out_shape=jax.ShapeDtypeStruct((2, b, cout, lp), jnp.float32),
        grid_spec=pltpu.PrefetchScalarGridSpec(
            num_scalar_prefetch=0,
            grid=grid,
            in_specs=[
                pl.BlockSpec((cin_t, 2, b, l_t), lambda co, lt, ci: (ci, 0, 0, lt)),
                pl.BlockSpec((cin_t, 3, ct, l_t), lambda co, lt, ci: (ci, 0, co, lt)),
            ],
            out_specs=pl.BlockSpec((2, b, ct, l_t), lambda co, lt, ci: (0, 0, co, lt)),
        ),
        compiler_params=pltpu.CompilerParams(
            dimension_semantics=("parallel", "parallel", "arbitrary"),
            vmem_limit_bytes=int(0.85 * cap),
        ),
    )(x_packed, w_packed)

    return out[0, :, :, :L], out[1, :, :, :L]


# ----------------------------------------------------------------------------
# MXU path (wide channels): per-mode real block matmuls (B x 2Cin)@(2Cin x 2Cout).
# ----------------------------------------------------------------------------

def _choose_mxu_mode_tile(n_modes, b, cin, cout, w_itemsize, vmem_budget):
    per_mode = ((2 * cin) * (2 * cout) * w_itemsize
                + b * 2 * cin * 4 + b * 2 * cout * 4)
    max_by_budget = max(1, vmem_budget // (2 * per_mode))    # double-buffered
    lt = max(1, min(n_modes, 128, max_by_budget))
    if lt >= n_modes and n_modes >= 2:
        lt = (n_modes + 1) // 2     # guarantee >=2 parallel grid steps (v7x megacore)
    lp = _round_up(n_modes, lt)
    return lt, lp


def _spectral_mix_mxu_kernel(x_ref, w_ref, o_ref):
    # x_ref: (l_t, B, 2Cin)       per retained mode: [xr | xi]
    # w_ref: (l_t, 2Cin, 2Cout)   per retained mode: [[wr, wi], [-wi, wr]]
    # o_ref: (l_t, B, 2Cout)      per retained mode: [out_r | out_i]
    l_t = x_ref.shape[0]

    def body(l, carry):
        xm = x_ref[l].astype(jnp.float32)
        wm = w_ref[l].astype(jnp.float32)
        o_ref[l] = jnp.dot(xm, wm, preferred_element_type=jnp.float32)
        return carry

    lax.fori_loop(0, l_t, body, 0, unroll=min(4, l_t))


def _spectral_mix_mxu(xr, xi, wr, wi, weight_dtype):
    """Complex channel mixing as per-mode real block matmuls on the MXU."""
    b, cin, L = xr.shape
    cout = wr.shape[1]

    cap = _vmem_capacity_bytes()
    vmem_budget = max(16 * 2 ** 20, int(0.4 * cap))
    l_t, lp = _choose_mxu_mode_tile(
        L, b, cin, cout, jnp.dtype(weight_dtype).itemsize, vmem_budget)
    pad = lp - L

    xk = jnp.concatenate([jnp.transpose(xr, (2, 0, 1)),
                          jnp.transpose(xi, (2, 0, 1))], axis=-1)     # (L, B, 2Cin)
    xk = jnp.pad(xk, ((0, pad), (0, 0), (0, 0)))

    wr_l = jnp.transpose(wr, (2, 0, 1))                                # (L, Cin, Cout)
    wi_l = jnp.transpose(wi, (2, 0, 1))
    wk = jnp.concatenate(
        [jnp.concatenate([wr_l, wi_l], axis=-1),
         jnp.concatenate([-wi_l, wr_l], axis=-1)], axis=1)            # (L, 2Cin, 2Cout)
    wk = jnp.pad(wk, ((0, pad), (0, 0), (0, 0))).astype(weight_dtype)

    out = pl.pallas_call(
        _spectral_mix_mxu_kernel,
        out_shape=jax.ShapeDtypeStruct((lp, b, 2 * cout), jnp.float32),
        grid_spec=pltpu.PrefetchScalarGridSpec(
            num_scalar_prefetch=0,
            grid=(lp // l_t,),
            in_specs=[
                pl.BlockSpec((l_t, b, 2 * cin), lambda i: (i, 0, 0)),
                pl.BlockSpec((l_t, 2 * cin, 2 * cout), lambda i: (i, 0, 0)),
            ],
            out_specs=pl.BlockSpec((l_t, b, 2 * cout), lambda i: (i, 0, 0)),
        ),
        compiler_params=pltpu.CompilerParams(
            dimension_semantics=("parallel",),
            vmem_limit_bytes=int(0.85 * cap),
        ),
    )(xk, wk)

    out = out[:L]
    out_r = jnp.transpose(out[:, :, :cout], (1, 2, 0))                 # (B, Cout, L)
    out_i = jnp.transpose(out[:, :, cout:], (1, 2, 0))
    return out_r, out_i


# ----------------------------------------------------------------------------
# Full forward pass.
# ----------------------------------------------------------------------------

def spectral_conv2d(x, weights1, weights2, modes1, modes2, *,
                    weight_dtype=jnp.float32):
    """Forward pass matching the PyTorch SpectralConv2d.

    x: (B, Cin, H, W) float32
    weights1 / weights2: (Cin, Cout, modes1, modes2) complex64
    weight_dtype: jnp.float32 (exact) or jnp.bfloat16 (halves the dominant
        weight DMA stream; f32 accumulation — re-check tolerances if used).
    returns: (B, Cout, H, W) float32
    """
    B, Cin, H, W = x.shape
    Cout = weights1.shape[1]
    Wf = W // 2 + 1
    L = 2 * modes1 * modes2                    # both retained-frequency blocks

    # FFT + mode gather (plain JAX / XLA).
    x_ft = jnp.fft.rfft2(x)                                            # (B,Cin,H,Wf)
    xm = jnp.stack([x_ft[:, :, :modes1, :modes2],
                    x_ft[:, :, H - modes1:, :modes2]], axis=2).reshape(B, Cin, L)
    xr = jnp.real(xm).astype(jnp.float32)
    xi = jnp.imag(xm).astype(jnp.float32)

    w = jnp.stack([weights1, weights2], axis=2).reshape(Cin, Cout, L)
    wr = jnp.real(w).astype(jnp.float32)
    wi = jnp.imag(w).astype(jnp.float32)

    if min(Cin, Cout) >= _MXU_MIN_CHANNELS:
        out_r, out_i = _spectral_mix_mxu(xr, xi, wr, wi, weight_dtype)
    else:
        out_r, out_i = _spectral_mix_vpu(xr, xi, wr, wi, weight_dtype)

    out_modes = (out_r + 1j * out_i).astype(jnp.complex64)
    out_modes = out_modes.reshape(B, Cout, 2, modes1, modes2)

    out_ft = jnp.zeros((B, Cout, H, Wf), dtype=jnp.complex64)
    out_ft = out_ft.at[:, :, :modes1, :modes2].set(out_modes[:, :, 0])
    out_ft = out_ft.at[:, :, H - modes1:, :modes2].set(out_modes[:, :, 1])

    out = jnp.fft.irfft2(out_ft, s=(H, W))
    return out.astype(jnp.float32)


def _reference_spectral_conv2d(x, w1, w2, modes1, modes2):
    """Pure-JAX reference identical to the PyTorch forward (for validation)."""
    B, Cin, H, W = x.shape
    Cout = w1.shape[1]
    x_ft = jnp.fft.rfft2(x)
    out_ft = jnp.zeros((B, Cout, H, W // 2 + 1), dtype=jnp.complex64)
    out_ft = out_ft.at[:, :, :modes1, :modes2].set(
        jnp.einsum('bixy,ioxy->boxy', x_ft[:, :, :modes1, :modes2], w1))
    out_ft = out_ft.at[:, :, H - modes1:, :modes2].set(
        jnp.einsum('bixy,ioxy->boxy', x_ft[:, :, H - modes1:, :modes2], w2))
    return jnp.fft.irfft2(out_ft, s=(H, W)).astype(jnp.float32)


def _make_inputs(key, B, Cin, Cout, H, W, modes1, modes2):
    kx, kw1r, kw1i, kw2r, kw2i = jax.random.split(key, 5)
    x = jax.random.normal(kx, (B, Cin, H, W), dtype=jnp.float32)
    # torch.rand(..., dtype=torch.cfloat) draws real/imag U[0,1); scale = 1/(Cin*Cout)
    scale = 1.0 / (Cin * Cout)
    w1 = scale * (jax.random.uniform(kw1r, (Cin, Cout, modes1, modes2))
                  + 1j * jax.random.uniform(kw1i, (Cin, Cout, modes1, modes2)))
    w2 = scale * (jax.random.uniform(kw2r, (Cin, Cout, modes1, modes2))
                  + 1j * jax.random.uniform(kw2i, (Cin, Cout, modes1, modes2)))
    return x, w1.astype(jnp.complex64), w2.astype(jnp.complex64)


if __name__ == "__main__":
    key = jax.random.PRNGKey(0)
    k1, k2 = jax.random.split(key)

    # 1) Small config from the module spec (narrow channels -> VPU kernel path).
    B, Cin, Cout, H, W, m1, m2 = 2, 4, 4, 16, 16, 4, 4
    x, w1, w2 = _make_inputs(k1, B, Cin, Cout, H, W, m1, m2)
    out = jax.block_until_ready(spectral_conv2d(x, w1, w2, m1, m2))
    assert out.shape == (B, Cout, H, W), out.shape
    assert out.dtype == jnp.float32, out.dtype
    ref = jax.block_until_ready(_reference_spectral_conv2d(x, w1, w2, m1, m2))
    err = float(jnp.max(jnp.abs(out - ref)))
    assert err < 1e-4, f"VPU path max abs error vs reference: {err}"

    # 2) Wide-channel config (exercises the MXU kernel path).
    B, Cin, Cout, H, W, m1, m2 = 2, 64, 64, 32, 32, 8, 8
    x, w1, w2 = _make_inputs(k2, B, Cin, Cout, H, W, m1, m2)
    out = jax.block_until_ready(spectral_conv2d(x, w1, w2, m1, m2))
    assert out.shape == (B, Cout, H, W), out.shape
    ref = jax.block_until_ready(_reference_spectral_conv2d(x, w1, w2, m1, m2))
    err = float(jnp.max(jnp.abs(out - ref)))
    assert err < 1e-4, f"MXU path max abs error vs reference: {err}"

    print("KERNEL_OK")
</pallas_src>

<mosaic_0001>
module attributes {stable_mosaic.version = 11 : i64} {
  func.func @_spectral_mix_vpu_kernel(%arg0: i32, %arg1: i32, %arg2: i32, %arg3: memref<4x2x2x128xf32, #tpu.memory_space<vmem>>, %arg4: memref<4x3x4x128xf32, #tpu.memory_space<vmem>>, %arg5: memref<2x2x4x128xf32, #tpu.memory_space<vmem>>) attributes {dimension_semantics = [#tpu.dimension_semantics<parallel>, #tpu.dimension_semantics<parallel>, #tpu.dimension_semantics<arbitrary>], iteration_bounds = array<i64: 1, 1, 1>, scalar_prefetch = 0 : i64, scratch_operands = 0 : i64, tpu.core_type = #tpu.core_type<tc>, window_params = [{transform_indices = @transform_0, window_bounds = array<i64: 4, 2, 2, 128>}, {transform_indices = @transform_1, window_bounds = array<i64: 4, 3, 4, 128>}, {transform_indices = @transform_2, window_bounds = array<i64: 2, 2, 4, 128>}]} {
    %cst = arith.constant 0.000000e+00 : f32
    %0 = vector.broadcast %cst : f32 to vector<2x4x128xf32>
    %c0_i32 = arith.constant 0 : i32
    %1 = arith.index_cast %c0_i32 : i32 to index
    %c0 = arith.constant 0 : index
    %c0_0 = arith.constant 0 : index
    %c0_1 = arith.constant 0 : index
    %2 = vector.load %arg3[%1, %c0, %c0_0, %c0_1] : memref<4x2x2x128xf32, #tpu.memory_space<vmem>>, vector<1x2x2x128xf32>
    %3 = vector.shape_cast %2 : vector<1x2x2x128xf32> to vector<2x2x128xf32>
    %4 = arith.index_cast %c0_i32 : i32 to index
    %c0_2 = arith.constant 0 : index
    %c0_3 = arith.constant 0 : index
    %c0_4 = arith.constant 0 : index
    %5 = vector.load %arg4[%4, %c0_2, %c0_3, %c0_4] : memref<4x3x4x128xf32, #tpu.memory_space<vmem>>, vector<1x3x4x128xf32>
    %6 = vector.shape_cast %5 : vector<1x3x4x128xf32> to vector<3x4x128xf32>
    %7 = vector.extract_strided_slice %3 {offsets = [0, 0, 0], sizes = [1, 2, 128], strides = [1, 1, 1]} : vector<2x2x128xf32> to vector<1x2x128xf32>
    %8 = vector.shape_cast %7 : vector<1x2x128xf32> to vector<2x128xf32>
    %9 = vector.extract_strided_slice %3 {offsets = [1, 0, 0], sizes = [1, 2, 128], strides = [1, 1, 1]} : vector<2x2x128xf32> to vector<1x2x128xf32>
    %10 = vector.shape_cast %9 : vector<1x2x128xf32> to vector<2x128xf32>
    %11 = vector.extract_strided_slice %6 {offsets = [0, 0, 0], sizes = [1, 4, 128], strides = [1, 1, 1]} : vector<3x4x128xf32> to vector<1x4x128xf32>
    %12 = vector.shape_cast %11 : vector<1x4x128xf32> to vector<4x128xf32>
    %13 = vector.extract_strided_slice %6 {offsets = [1, 0, 0], sizes = [1, 4, 128], strides = [1, 1, 1]} : vector<3x4x128xf32> to vector<1x4x128xf32>
    %14 = vector.shape_cast %13 : vector<1x4x128xf32> to vector<4x128xf32>
    %15 = vector.extract_strided_slice %6 {offsets = [2, 0, 0], sizes = [1, 4, 128], strides = [1, 1, 1]} : vector<3x4x128xf32> to vector<1x4x128xf32>
    %16 = vector.shape_cast %15 : vector<1x4x128xf32> to vector<4x128xf32>
    %17 = arith.addf %8, %10 : vector<2x128xf32>
    %18 = vector.shape_cast %17 : vector<2x128xf32> to vector<2x1x128xf32>
    %19 = vector.shape_cast %12 : vector<4x128xf32> to vector<1x4x128xf32>
    %20 = vector.broadcast %18 : vector<2x1x128xf32> to vector<2x4x128xf32>
    %21 = vector.broadcast %19 : vector<1x4x128xf32> to vector<2x4x128xf32>
    %22 = arith.mulf %20, %21 : vector<2x4x128xf32>
    %23 = vector.shape_cast %10 : vector<2x128xf32> to vector<2x1x128xf32>
    %24 = vector.shape_cast %16 : vector<4x128xf32> to vector<1x4x128xf32>
    %25 = vector.broadcast %23 : vector<2x1x128xf32> to vector<2x4x128xf32>
    %26 = vector.broadcast %24 : vector<1x4x128xf32> to vector<2x4x128xf32>
    %27 = arith.mulf %25, %26 : vector<2x4x128xf32>
    %28 = arith.subf %22, %27 : vector<2x4x128xf32>
    %29 = arith.addf %0, %28 : vector<2x4x128xf32>
    %30 = vector.shape_cast %8 : vector<2x128xf32> to vector<2x1x128xf32>
    %31 = vector.shape_cast %14 : vector<4x128xf32> to vector<1x4x128xf32>
    %32 = vector.broadcast %30 : vector<2x1x128xf32> to vector<2x4x128xf32>
    %33 = vector.broadcast %31 : vector<1x4x128xf32> to vector<2x4x128xf32>
    %34 = arith.mulf %32, %33 : vector<2x4x128xf32>
    %35 = arith.addf %22, %34 : vector<2x4x128xf32>
    %36 = arith.addf %0, %35 : vector<2x4x128xf32>
    %c1_i32 = arith.constant 1 : i32
    %37 = arith.index_cast %c1_i32 : i32 to index
    %c0_5 = arith.constant 0 : index
    %c0_6 = arith.constant 0 : index
    %c0_7 = arith.constant 0 : index
    %38 = vector.load %arg3[%37, %c0_5, %c0_6, %c0_7] : memref<4x2x2x128xf32, #tpu.memory_space<vmem>>, vector<1x2x2x128xf32>
    %39 = vector.shape_cast %38 : vector<1x2x2x128xf32> to vector<2x2x128xf32>
    %40 = arith.index_cast %c1_i32 : i32 to index
    %c0_8 = arith.constant 0 : index
    %c0_9 = arith.constant 0 : index
    %c0_10 = arith.constant 0 : index
    %41 = vector.load %arg4[%40, %c0_8, %c0_9, %c0_10] : memref<4x3x4x128xf32, #tpu.memory_space<vmem>>, vector<1x3x4x128xf32>
    %42 = vector.shape_cast %41 : vector<1x3x4x128xf32> to vector<3x4x128xf32>
    %43 = vector.extract_strided_slice %39 {offsets = [0, 0, 0], sizes = [1, 2, 128], strides = [1, 1, 1]} : vector<2x2x128xf32> to vector<1x2x128xf32>
    %44 = vector.shape_cast %43 : vector<1x2x128xf32> to vector<2x128xf32>
    %45 = vector.extract_strided_slice %39 {offsets = [1, 0, 0], sizes = [1, 2, 128], strides = [1, 1, 1]} : vector<2x2x128xf32> to vector<1x2x128xf32>
    %46 = vector.shape_cast %45 : vector<1x2x128xf32> to vector<2x128xf32>
    %47 = vector.extract_strided_slice %42 {offsets = [0, 0, 0], sizes = [1, 4, 128], strides = [1, 1, 1]} : vector<3x4x128xf32> to vector<1x4x128xf32>
    %48 = vector.shape_cast %47 : vector<1x4x128xf32> to vector<4x128xf32>
    %49 = vector.extract_strided_slice %42 {offsets = [1, 0, 0], sizes = [1, 4, 128], strides = [1, 1, 1]} : vector<3x4x128xf32> to vector<1x4x128xf32>
    %50 = vector.shape_cast %49 : vector<1x4x128xf32> to vector<4x128xf32>
    %51 = vector.extract_strided_slice %42 {offsets = [2, 0, 0], sizes = [1, 4, 128], strides = [1, 1, 1]} : vector<3x4x128xf32> to vector<1x4x128xf32>
    %52 = vector.shape_cast %51 : vector<1x4x128xf32> to vector<4x128xf32>
    %53 = arith.addf %44, %46 : vector<2x128xf32>
    %54 = vector.shape_cast %53 : vector<2x128xf32> to vector<2x1x128xf32>
    %55 = vector.shape_cast %48 : vector<4x128xf32> to vector<1x4x128xf32>
    %56 = vector.broadcast %54 : vector<2x1x128xf32> to vector<2x4x128xf32>
    %57 = vector.broadcast %55 : vector<1x4x128xf32> to vector<2x4x128xf32>
    %58 = arith.mulf %56, %57 : vector<2x4x128xf32>
    %59 = vector.shape_cast %46 : vector<2x128xf32> to vector<2x1x128xf32>
    %60 = vector.shape_cast %52 : vector<4x128xf32> to vector<1x4x128xf32>
    %61 = vector.broadcast %59 : vector<2x1x128xf32> to vector<2x4x128xf32>
    %62 = vector.broadcast %60 : vector<1x4x128xf32> to vector<2x4x128xf32>
    %63 = arith.mulf %61, %62 : vector<2x4x128xf32>
    %64 = arith.subf %58, %63 : vector<2x4x128xf32>
    %65 = arith.addf %29, %64 : vector<2x4x128xf32>
    %66 = vector.shape_cast %44 : vector<2x128xf32> to vector<2x1x128xf32>
    %67 = vector.shape_cast %50 : vector<4x128xf32> to vector<1x4x128xf32>
    %68 = vector.broadcast %66 : vector<2x1x128xf32> to vector<2x4x128xf32>
    %69 = vector.broadcast %67 : vector<1x4x128xf32> to vector<2x4x128xf32>
    %70 = arith.mulf %68, %69 : vector<2x4x128xf32>
    %71 = arith.addf %58, %70 : vector<2x4x128xf32>
    %72 = arith.addf %36, %71 : vector<2x4x128xf32>
    %c2_i32 = arith.constant 2 : i32
    %73 = arith.index_cast %c2_i32 : i32 to index
    %c0_11 = arith.constant 0 : index
    %c0_12 = arith.constant 0 : index
    %c0_13 = arith.constant 0 : index
    %74 = vector.load %arg3[%73, %c0_11, %c0_12, %c0_13] : memref<4x2x2x128xf32, #tpu.memory_space<vmem>>, vector<1x2x2x128xf32>
    %75 = vector.shape_cast %74 : vector<1x2x2x128xf32> to vector<2x2x128xf32>
    %76 = arith.index_cast %c2_i32 : i32 to index
    %c0_14 = arith.constant 0 : index
    %c0_15 = arith.constant 0 : index
    %c0_16 = arith.constant 0 : index
    %77 = vector.load %arg4[%76, %c0_14, %c0_15, %c0_16] : memref<4x3x4x128xf32, #tpu.memory_space<vmem>>, vector<1x3x4x128xf32>
    %78 = vector.shape_cast %77 : vector<1x3x4x128xf32> to vector<3x4x128xf32>
    %79 = vector.extract_strided_slice %75 {offsets = [0, 0, 0], sizes = [1, 2, 128], strides = [1, 1, 1]} : vector<2x2x128xf32> to vector<1x2x128xf32>
    %80 = vector.shape_cast %79 : vector<1x2x128xf32> to vector<2x128xf32>
    %81 = vector.extract_strided_slice %75 {offsets = [1, 0, 0], sizes = [1, 2, 128], strides = [1, 1, 1]} : vector<2x2x128xf32> to vector<1x2x128xf32>
    %82 = vector.shape_cast %81 : vector<1x2x128xf32> to vector<2x128xf32>
    %83 = vector.extract_strided_slice %78 {offsets = [0, 0, 0], sizes = [1, 4, 128], strides = [1, 1, 1]} : vector<3x4x128xf32> to vector<1x4x128xf32>
    %84 = vector.shape_cast %83 : vector<1x4x128xf32> to vector<4x128xf32>
    %85 = vector.extract_strided_slice %78 {offsets = [1, 0, 0], sizes = [1, 4, 128], strides = [1, 1, 1]} : vector<3x4x128xf32> to vector<1x4x128xf32>
    %86 = vector.shape_cast %85 : vector<1x4x128xf32> to vector<4x128xf32>
    %87 = vector.extract_strided_slice %78 {offsets = [2, 0, 0], sizes = [1, 4, 128], strides = [1, 1, 1]} : vector<3x4x128xf32> to vector<1x4x128xf32>
    %88 = vector.shape_cast %87 : vector<1x4x128xf32> to vector<4x128xf32>
    %89 = arith.addf %80, %82 : vector<2x128xf32>
    %90 = vector.shape_cast %89 : vector<2x128xf32> to vector<2x1x128xf32>
    %91 = vector.shape_cast %84 : vector<4x128xf32> to vector<1x4x128xf32>
    %92 = vector.broadcast %90 : vector<2x1x128xf32> to vector<2x4x128xf32>
    %93 = vector.broadcast %91 : vector<1x4x128xf32> to vector<2x4x128xf32>
    %94 = arith.mulf %92, %93 : vector<2x4x128xf32>
    %95 = vector.shape_cast %82 : vector<2x128xf32> to vector<2x1x128xf32>
    %96 = vector.shape_cast %88 : vector<4x128xf32> to vector<1x4x128xf32>
    %97 = vector.broadcast %95 : vector<2x1x128xf32> to vector<2x4x128xf32>
    %98 = vector.broadcast %96 : vector<1x4x128xf32> to vector<2x4x128xf32>
    %99 = arith.mulf %97, %98 : vector<2x4x128xf32>
    %100 = arith.subf %94, %99 : vector<2x4x128xf32>
    %101 = arith.addf %65, %100 : vector<2x4x128xf32>
    %102 = vector.shape_cast %80 : vector<2x128xf32> to vector<2x1x128xf32>
    %103 = vector.shape_cast %86 : vector<4x128xf32> to vector<1x4x128xf32>
    %104 = vector.broadcast %102 : vector<2x1x128xf32> to vector<2x4x128xf32>
    %105 = vector.broadcast %103 : vector<1x4x128xf32> to vector<2x4x128xf32>
    %106 = arith.mulf %104, %105 : vector<2x4x128xf32>
    %107 = arith.addf %94, %106 : vector<2x4x128xf32>
    %108 = arith.addf %72, %107 : vector<2x4x128xf32>
    %c3_i32 = arith.constant 3 : i32
    %109 = arith.index_cast %c3_i32 : i32 to index
    %c0_17 = arith.constant 0 : index
    %c0_18 = arith.constant 0 : index
    %c0_19 = arith.constant 0 : index
    %110 = vector.load %arg3[%109, %c0_17, %c0_18, %c0_19] : memref<4x2x2x128xf32, #tpu.memory_space<vmem>>, vector<1x2x2x128xf32>
    %111 = vector.shape_cast %110 : vector<1x2x2x128xf32> to vector<2x2x128xf32>
    %112 = arith.index_cast %c3_i32 : i32 to index
    %c0_20 = arith.constant 0 : index
    %c0_21 = arith.constant 0 : index
    %c0_22 = arith.constant 0 : index
    %113 = vector.load %arg4[%112, %c0_20, %c0_21, %c0_22] : memref<4x3x4x128xf32, #tpu.memory_space<vmem>>, vector<1x3x4x128xf32>
    %114 = vector.shape_cast %113 : vector<1x3x4x128xf32> to vector<3x4x128xf32>
    %115 = vector.extract_strided_slice %111 {offsets = [0, 0, 0], sizes = [1, 2, 128], strides = [1, 1, 1]} : vector<2x2x128xf32> to vector<1x2x128xf32>
    %116 = vector.shape_cast %115 : vector<1x2x128xf32> to vector<2x128xf32>
    %117 = vector.extract_strided_slice %111 {offsets = [1, 0, 0], sizes = [1, 2, 128], strides = [1, 1, 1]} : vector<2x2x128xf32> to vector<1x2x128xf32>
    %118 = vector.shape_cast %117 : vector<1x2x128xf32> to vector<2x128xf32>
    %119 = vector.extract_strided_slice %114 {offsets = [0, 0, 0], sizes = [1, 4, 128], strides = [1, 1, 1]} : vector<3x4x128xf32> to vector<1x4x128xf32>
    %120 = vector.shape_cast %119 : vector<1x4x128xf32> to vector<4x128xf32>
    %121 = vector.extract_strided_slice %114 {offsets = [1, 0, 0], sizes = [1, 4, 128], strides = [1, 1, 1]} : vector<3x4x128xf32> to vector<1x4x128xf32>
    %122 = vector.shape_cast %121 : vector<1x4x128xf32> to vector<4x128xf32>
    %123 = vector.extract_strided_slice %114 {offsets = [2, 0, 0], sizes = [1, 4, 128], strides = [1, 1, 1]} : vector<3x4x128xf32> to vector<1x4x128xf32>
    %124 = vector.shape_cast %123 : vector<1x4x128xf32> to vector<4x128xf32>
    %125 = arith.addf %116, %118 : vector<2x128xf32>
    %126 = vector.shape_cast %125 : vector<2x128xf32> to vector<2x1x128xf32>
    %127 = vector.shape_cast %120 : vector<4x128xf32> to vector<1x4x128xf32>
    %128 = vector.broadcast %126 : vector<2x1x128xf32> to vector<2x4x128xf32>
    %129 = vector.broadcast %127 : vector<1x4x128xf32> to vector<2x4x128xf32>
    %130 = arith.mulf %128, %129 : vector<2x4x128xf32>
    %131 = vector.shape_cast %118 : vector<2x128xf32> to vector<2x1x128xf32>
    %132 = vector.shape_cast %124 : vector<4x128xf32> to vector<1x4x128xf32>
    %133 = vector.broadcast %131 : vector<2x1x128xf32> to vector<2x4x128xf32>
    %134 = vector.broadcast %132 : vector<1x4x128xf32> to vector<2x4x128xf32>
    %135 = arith.mulf %133, %134 : vector<2x4x128xf32>
    %136 = arith.subf %130, %135 : vector<2x4x128xf32>
    %137 = arith.addf %101, %136 : vector<2x4x128xf32>
    %138 = vector.shape_cast %116 : vector<2x128xf32> to vector<2x1x128xf32>
    %139 = vector.shape_cast %122 : vector<4x128xf32> to vector<1x4x128xf32>
    %140 = vector.broadcast %138 : vector<2x1x128xf32> to vector<2x4x128xf32>
    %141 = vector.broadcast %139 : vector<1x4x128xf32> to vector<2x4x128xf32>
    %142 = arith.mulf %140, %141 : vector<2x4x128xf32>
    %143 = arith.addf %130, %142 : vector<2x4x128xf32>
    %144 = arith.addf %108, %143 : vector<2x4x128xf32>
    %c4_i32 = arith.constant 4 : i32
    %c0_i32_23 = arith.constant 0 : i32
    %145 = arith.cmpi eq, %arg2, %c0_i32_23 : i32
    %146 = arith.extui %145 : i1 to i32
    %c0_i32_24 = arith.constant 0 : i32
    %147 = arith.cmpi ne, %146, %c0_i32_24 : i32
    scf.if %147 {
      %c0_27 = arith.constant 0 : index
      %c0_28 = arith.constant 0 : index
      %c0_29 = arith.constant 0 : index
      %c0_30 = arith.constant 0 : index
      %151 = vector.load %arg5[%c0_27, %c0_28, %c0_29, %c0_30] : memref<2x2x4x128xf32, #tpu.memory_space<vmem>>, vector<1x2x4x128xf32>
      %152 = vector.shape_cast %151 : vector<1x2x4x128xf32> to vector<2x4x128xf32>
      %153 = vector.shape_cast %137 : vector<2x4x128xf32> to vector<1x2x4x128xf32>
      tpu.vector_store %arg5[%c0_27, %c0_28, %c0_29, %c0_30], %153 {strides = array<i32>} : memref<2x2x4x128xf32, #tpu.memory_space<vmem>>, vector<1x2x4x128xf32>,
      %c1 = arith.constant 1 : index
      %c0_31 = arith.constant 0 : index
      %c0_32 = arith.constant 0 : index
      %c0_33 = arith.constant 0 : index
      %154 = vector.load %arg5[%c1, %c0_31, %c0_32, %c0_33] : memref<2x2x4x128xf32, #tpu.memory_space<vmem>>, vector<1x2x4x128xf32>
      %155 = vector.shape_cast %154 : vector<1x2x4x128xf32> to vector<2x4x128xf32>
      %156 = vector.shape_cast %144 : vector<2x4x128xf32> to vector<1x2x4x128xf32>
      tpu.vector_store %arg5[%c1, %c0_31, %c0_32, %c0_33], %156 {strides = array<i32>} : memref<2x2x4x128xf32, #tpu.memory_space<vmem>>, vector<1x2x4x128xf32>,
    } else {
    }
    %c0_i32_25 = arith.constant 0 : i32
    %148 = arith.cmpi sgt, %arg2, %c0_i32_25 : i32
    %149 = arith.extui %148 : i1 to i32
    %c0_i32_26 = arith.constant 0 : i32
    %150 = arith.cmpi ne, %149, %c0_i32_26 : i32
    scf.if %150 {
      %c0_27 = arith.constant 0 : index
      %c0_28 = arith.constant 0 : index
      %c0_29 = arith.constant 0 : index
      %c0_30 = arith.constant 0 : index
      %151 = vector.load %arg5[%c0_27, %c0_28, %c0_29, %c0_30] : memref<2x2x4x128xf32, #tpu.memory_space<vmem>>, vector<1x2x4x128xf32>
      %152 = vector.shape_cast %151 : vector<1x2x4x128xf32> to vector<2x4x128xf32>
      %153 = arith.addf %152, %137 : vector<2x4x128xf32>
      %c0_31 = arith.constant 0 : index
      %c0_32 = arith.constant 0 : index
      %c0_33 = arith.constant 0 : index
      %c0_34 = arith.constant 0 : index
      %154 = vector.load %arg5[%c0_31, %c0_32, %c0_33, %c0_34] : memref<2x2x4x128xf32, #tpu.memory_space<vmem>>, vector<1x2x4x128xf32>
      %155 = vector.shape_cast %154 : vector<1x2x4x128xf32> to vector<2x4x128xf32>
      %156 = vector.shape_cast %153 : vector<2x4x128xf32> to vector<1x2x4x128xf32>
      tpu.vector_store %arg5[%c0_31, %c0_32, %c0_33, %c0_34], %156 {strides = array<i32>} : memref<2x2x4x128xf32, #tpu.memory_space<vmem>>, vector<1x2x4x128xf32>,
      %c1 = arith.constant 1 : index
      %c0_35 = arith.constant 0 : index
      %c0_36 = arith.constant 0 : index
      %c0_37 = arith.constant 0 : index
      %157 = vector.load %arg5[%c1, %c0_35, %c0_36, %c0_37] : memref<2x2x4x128xf32, #tpu.memory_space<vmem>>, vector<1x2x4x128xf32>
      %158 = vector.shape_cast %157 : vector<1x2x4x128xf32> to vector<2x4x128xf32>
      %159 = arith.addf %158, %144 : vector<2x4x128xf32>
      %c1_38 = arith.constant 1 : index
      %c0_39 = arith.constant 0 : index
      %c0_40 = arith.constant 0 : index
      %c0_41 = arith.constant 0 : index
      %160 = vector.load %arg5[%c1_38, %c0_39, %c0_40, %c0_41] : memref<2x2x4x128xf32, #tpu.memory_space<vmem>>, vector<1x2x4x128xf32>
      %161 = vector.shape_cast %160 : vector<1x2x4x128xf32> to vector<2x4x128xf32>
      %162 = vector.shape_cast %159 : vector<2x4x128xf32> to vector<1x2x4x128xf32>
      tpu.vector_store %arg5[%c1_38, %c0_39, %c0_40, %c0_41], %162 {strides = array<i32>} : memref<2x2x4x128xf32, #tpu.memory_space<vmem>>, vector<1x2x4x128xf32>,
    } else {
    }
    return
  }
  func.func @transform_0(%arg0: i32, %arg1: i32, %arg2: i32) -> (i32, i32, i32, i32) {
    %c0_i32 = arith.constant 0 : i32
    %c0_i32_0 = arith.constant 0 : i32
    %c0_i32_1 = arith.constant 0 : i32
    return %arg2, %c0_i32, %c0_i32_0, %arg1 : i32, i32, i32, i32
  }
  func.func @transform_1(%arg0: i32, %arg1: i32, %arg2: i32) -> (i32, i32, i32, i32) {
    %c0_i32 = arith.constant 0 : i32
    %c0_i32_0 = arith.constant 0 : i32
    return %arg2, %c0_i32, %arg0, %arg1 : i32, i32, i32, i32
  }
  func.func @transform_2(%arg0: i32, %arg1: i32, %arg2: i32) -> (i32, i32, i32, i32) {
    %c0_i32 = arith.constant 0 : i32
    %c0_i32_0 = arith.constant 0 : i32
    %c0_i32_1 = arith.constant 0 : i32
    return %c0_i32, %c0_i32_0, %arg0, %arg1 : i32, i32, i32, i32
  }
}

</mosaic_0001>

<bundles_post_ra>
// kernel: tpu_custom_call.1
= control target key start
LH: loop header
LB: loop body
LE: loop exit
PB: predicated region body
PF: predicated region fallthrough
CT: control target
= control target key end

     0   :  { %7 = vsyncpa [#allocation3], 0  ;;  %s390_s0 = inlined_call_operand.hbm [shape: f32[4,2,2,128], index: 0, kind: input, shape index: {}]   ;;  %s391_s1 = inlined_call_operand.hbm [shape: f32[4,3,4,128], index: 1, kind: input, shape index: {}]   ;;  %s392_s2 = inlined_call_operand.hbm [shape: f32[2,2,4,128], index: 2, kind: output, shape index: {}]  }
   0x1   :  { %8 = vsyncpa [#allocation6], 0 }
   0x2   :  { %9 = vsyncpa [#allocation4], 0  ;;  %s14_s11 = sshll.u32 %s390_s0, 4  ;;  %s333_s12 = smov [#allocation2]   ;;  %s15_s11 = int_to_ptr.hbm [resolvable:$true] %s14_s11 }
   0x3   :  { %s16_s13 = sshll.u32 %s333_s12, 4  ;;  %s27_s16 = sshll.u32 %s391_s1, 4  ;;  %s17_s13 = int_to_ptr.vmem [resolvable:$true] %s16_s13  ;;  %s28_s16 = int_to_ptr.hbm [resolvable:$true] %s27_s16 }
   0x4   :  { %s334_s17 = smov 32   ;;  %s335_s18 = smov 2  }
   0x5   :  { %22 = dma.hbm_to_vmem [thread:$0]  %s15_s11, 256, %s17_s13, [#allocation3], %s334_s17, %s334_s17, %s335_s18  }
   0x6   :  { %s336_s19 = smov [#allocation5]   ;;  %s337_s21 = smov 64  }
   0x7   :  { %s29_s20 = sshll.u32 %s336_s19, 4  ;;  %s338_s22 = smov 4   ;;  %s30_s20 = int_to_ptr.vmem [resolvable:$true] %s29_s20 }
   0x8   :  { %35 = dma.hbm_to_vmem [thread:$0]  %s28_s16, 768, %s30_s20, [#allocation6], %s337_s21, %s337_s21, %s338_s22  }
   0x9   :  { %327 = dma.done.wait [#allocation3], 256  }
   0xa   :  { %328 = vsyncadd [#allocation3], 4294967040 }
   0xb   :  { %329 = dma.done.wait [#allocation6], 768  }
   0xc   :  { %330 = vsyncadd [#allocation6], 4294966528  ;;  %v364_v0 = vld [vmem:[#allocation2] sm:$0x3]  ;;  %v45_v1 = vld [vmem:[#allocation2 + $0x2] sm:$0x3] }
   0xd   :  { %v46_v2 = vld [vmem:[#allocation5] sm:$0xf]  ;;  %v48_v3 = vld [vmem:[#allocation5 + $0x8] sm:$0xf]  ;;  %v49_v4 = vadd.f32 %v45_v1, %v364_v0  ;;  %v60_v5 = vperm.slane %v45_v1, 0  ;;  %v59_v7 = vrot.slane %v45_v1, 1 }
   0xe   :  { %v367_v6 = vld [vmem:[#allocation2 + $0x4] sm:$0x3]  ;;  %v84_v8 = vld [vmem:[#allocation2 + $0x6] sm:$0x3]  ;;  %v86_v9 = vld [vmem:[#allocation5 + $0xc] sm:$0xf] }
   0xf   :  { %v88_v10 = vld [vmem:[#allocation5 + $0x14] sm:$0xf]  ;;  %v52_v11 = vperm.slane %v49_v4, 0  ;;  %v64_v12 = vmul.f32 %v60_v5, %v48_v3  ;;  %v89_v13 = vadd.f32 %v84_v8, %v367_v6  ;;  %v100_v14 = vperm.slane %v84_v8, 0  ;;  %v370_v15 = vld [vmem:[#allocation2 + $0x8] sm:$0x3] }
  0x10   :  { %v124_v16 = vld [vmem:[#allocation2 + $0xa] sm:$0x3]  ;;  %v128_v18 = vld [vmem:[#allocation5 + $0x20] sm:$0xf]  ;;  %v51_v21 = vrot.slane %v49_v4, 1  ;;  %v61_v27 = vperm.slane %v59_v7, 0 }
  0x11   :  { %v126_v17 = vld [vmem:[#allocation5 + $0x18] sm:$0xf]  ;;  %v129_v19 = vadd.f32 %v124_v16, %v370_v15  ;;  %v140_v20 = vperm.slane %v124_v16, 0  ;;  %v56_v22 = vmul.f32 %v52_v11, %v46_v2  ;;  %v92_v23 = vperm.slane %v89_v13, 0  ;;  %v373_v25 = vld [vmem:[#allocation2 + $0xc] sm:$0x3] }
  0x12   :  { %v104_v24 = vmul.f32 %v100_v14, %v88_v10  ;;  %v164_v26 = vld [vmem:[#allocation2 + $0xe] sm:$0x3]  ;;  %v168_v30 = vld [vmem:[#allocation5 + $0x2c] sm:$0xf]  ;;  %v166_v35 = vld [vmem:[#allocation5 + $0x24] sm:$0xf]  ;;  %v65_v37 = vmul.f32 %v61_v27, %v48_v3 }
  0x13   :  { %v132_v28 = vperm.slane %v129_v19, 0  ;;  %v144_v29 = vmul.f32 %v140_v20, %v128_v18  ;;  %v169_v31 = vadd.f32 %v164_v26, %v373_v25  ;;  %v180_v32 = vperm.slane %v164_v26, 0  ;;  %v47_v62 = vld [vmem:[#allocation5 + $0x4] sm:$0xf]  ;;  %v87_v63 = vld [vmem:[#allocation5 + $0x10] sm:$0xf] }
  0x14   :  { %v66_v33 = vsub.f32 %v56_v22, %v64_v12  ;;  %v96_v34 = vmul.f32 %v92_v23, %v86_v9  ;;  %v53_v36 = vperm.slane %v51_v21, 0  ;;  %v91_v41 = vrot.slane %v89_v13, 1  ;;  %v127_v5 = vld [vmem:[#allocation5 + $0x1c] sm:$0xf]  ;;  %s339_s0 = smov [#allocation7]   ;;  %s234_s25 = sshll.u32 %s392_s2, 4  ;;  %s235_s25 = int_to_ptr.hbm [resolvable:$true] %s234_s25 }
  0x15   :  { %v136_v38 = vmul.f32 %v132_v28, %v126_v17  ;;  %v172_v39 = vperm.slane %v169_v31, 0  ;;  %v184_v40 = vmul.f32 %v180_v32, %v168_v30  ;;  %v99_v44 = vrot.slane %v84_v8, 1  ;;  %s232_s1 = sshll.u32 %s339_s0, 4  ;;  %s233_s1 = int_to_ptr.vmem [resolvable:$true] %s232_s1 }
  0x16   :  { %v106_v42 = vsub.f32 %v96_v34, %v104_v24  ;;  %v57_v43 = vmul.f32 %v53_v36, %v46_v2  ;;  %v131_v45 = vrot.slane %v129_v19, 1  ;;  %v93_v48 = vperm.slane %v91_v41, 0 }
  0x17   :  { %v146_v46 = vsub.f32 %v136_v38, %v144_v29  ;;  %v176_v47 = vmul.f32 %v172_v39, %v166_v35  ;;  %v139_v49 = vrot.slane %v124_v16, 1  ;;  %v101_v52 = vperm.slane %v99_v44, 0  ;;  %v167_v16 = vld [vmem:[#allocation5 + $0x28] sm:$0xf] }
  0x18   :  { %v108_v50 = vadd.f32 %v106_v42, %v66_v33  ;;  %v67_v51 = vsub.f32 %v57_v43, %v65_v37  ;;  %v133_v53 = vperm.slane %v131_v45, 0  ;;  %v97_v55 = vmul.f32 %v93_v48, %v86_v9 }
  0x19   :  { %v186_v54 = vsub.f32 %v176_v47, %v184_v40  ;;  %v141_v56 = vperm.slane %v139_v49, 0  ;;  %v171_v57 = vrot.slane %v169_v31, 1  ;;  %v105_v59 = vmul.f32 %v101_v52, %v88_v10 }
  0x1a   :  { %v148_v58 = vadd.f32 %v146_v46, %v108_v50  ;;  %v137_v60 = vmul.f32 %v133_v53, %v126_v17  ;;  %v179_v61 = vrot.slane %v164_v26, 1  ;;  %v72_v3 = vperm.slane %v364_v0, 0 }
  0x1b   :  { %v145_v1 = vmul.f32 %v141_v56, %v128_v18  ;;  %v173_v2 = vperm.slane %v171_v57, 0  ;;  %v112_v4 = vperm.slane %v367_v6, 0  ;;  %v107_v8 = vsub.f32 %v97_v55, %v105_v59 }
  0x1c   :  { %v188_v7 = vadd.f32 %v186_v54, %v148_v58  ;;  %v181_v11 = vperm.slane %v179_v61, 0  ;;  %v152_v9 = vperm.slane %v370_v15, 0  ;;  %v76_v14 = vmul.f32 %v72_v3, %v47_v62 }
  0x1d   :  { %v147_v12 = vsub.f32 %v137_v60, %v145_v1  ;;  %v177_v13 = vmul.f32 %v173_v2, %v166_v35  ;;  %v116_v10 = vmul.f32 %v112_v4, %v87_v63  ;;  %v109_v17 = vadd.f32 %v107_v8, %v67_v51 }
  0x1e   :  { %206 = vst [vmem:[#allocation7] sm:$0xf] %v188_v7  ;;  %v185_v19 = vmul.f32 %v181_v11, %v168_v30  ;;  %v156_v18 = vmul.f32 %v152_v9, %v127_v5  ;;  %v192_v20 = vperm.slane %v373_v25, 0  ;;  %v78_v21 = vadd.f32 %v76_v14, %v56_v22 }
  0x1f   :  { %v118_v23 = vadd.f32 %v116_v10, %v96_v34  ;;  %v71_v24 = vrot.slane %v364_v0, 1  ;;  %v111_v26 = vrot.slane %v367_v6, 1  ;;  %v149_v27 = vadd.f32 %v147_v12, %v109_v17 }
  0x20   :  { %v187_v28 = vsub.f32 %v177_v13, %v185_v19  ;;  %v158_v29 = vadd.f32 %v156_v18, %v136_v38  ;;  %v196_v31 = vmul.f32 %v192_v20, %v167_v16  ;;  %v151_v36 = vrot.slane %v370_v15, 1 }
  0x21   :  { %v120_v32 = vadd.f32 %v118_v23, %v78_v21  ;;  %v73_v33 = vperm.slane %v71_v24, 0  ;;  %v113_v35 = vperm.slane %v111_v26, 0  ;;  %v191_v39 = vrot.slane %v373_v25, 1 }
  0x22   :  { %v189_v37 = vadd.f32 %v187_v28, %v149_v27  ;;  %v198_v30 = vadd.f32 %v196_v31, %v176_v47  ;;  %v153_v41 = vperm.slane %v151_v36, 0 }
  0x23   :  { %v160_v40 = vadd.f32 %v158_v29, %v120_v32  ;;  %v77_v22 = vmul.f32 %v73_v33, %v47_v62  ;;  %v117_v34 = vmul.f32 %v113_v35, %v87_v63  ;;  %v193_v0 = vperm.slane %v191_v39, 0 }
  0x24   :  { %207 = vst [vmem:[#allocation7 + $0x4] sm:$0xf] %v189_v37  ;;  %v157_v38 = vmul.f32 %v153_v41, %v127_v5 }
  0x25   :  { %v200_v6 = vadd.f32 %v198_v30, %v160_v40  ;;  %v79_v42 = vadd.f32 %v77_v22, %v57_v43  ;;  %v119_v44 = vadd.f32 %v117_v34, %v97_v55  ;;  %v197_v45 = vmul.f32 %v193_v0, %v167_v16 }
  0x26   :  { %v159_v48 = vadd.f32 %v157_v38, %v137_v60 }
  0x27   :  { %209 = vst [vmem:[#allocation7 + $0x8] sm:$0xf] %v200_v6  ;;  %v121_v46 = vadd.f32 %v119_v44, %v79_v42  ;;  %v199_v49 = vadd.f32 %v197_v45, %v177_v13 }
  0x29   :  { %v161_v15 = vadd.f32 %v159_v48, %v121_v46 }
  0x2b   :  { %v201_v25 = vadd.f32 %v199_v49, %v161_v15 }
  0x2d   :  { %210 = vst [vmem:[#allocation7 + $0xc] sm:$0xf] %v201_v25 }
  0x2e   :  { %240 = dma.vmem_to_hbm [thread:$0]  %s233_s1, 256, %s235_s25, [#allocation4], %s337_s21, %s337_s21, %s338_s22  }
  0x2f   :  { %331 = dma.done.wait [#allocation4], 256  }
  0x30   :  { %332 = vsyncadd [#allocation4], 4294967040 }
  0x31   :  { %245 = vsyncpa [#allocation3], 1 }
  0x32   :  { %246 = vsyncpa [#allocation6], 1 }
  0x33   :  { %247 = vsyncpa [#allocation4], 1 }

</bundles_post_ra>
